<compile_context>
chip_gen: v6e
topology: v6e:2x2x1
jax: 0.10.0
libtpu: 0.0.40
codegen_flags: <defaults>
</compile_context>

<pallas_src>
import functools

import jax
import jax.numpy as jnp
from jax import lax
from jax.experimental import pallas as pl
from jax.experimental.pallas import tpu as pltpu


def _round_up(n, m):
    return ((n + m - 1) // m) * m


def _sublane(dtype):
    # Sublane packing of one vreg: 8 rows for 4-byte, 16 for 2-byte, 32 for 1-byte.
    return max(8, 32 // jnp.dtype(dtype).itemsize)


def _tpu_config():
    """(block_bytes, vmem_limit_bytes, min_grid_steps) per TPU generation.

    Falls back to the most conservative (v7x-safe) setting if the query fails.
    """
    block_bytes = 6 * 1024 * 1024        # 2 arrays x 2 buffers x 6 MiB = 24 MiB
    vmem_limit = 40 * 1024 * 1024        # < v7x's 64 MiB physical VMEM per core
    min_steps = 4                        # keep both v7x TensorCores busy
    try:
        info = pltpu.get_tpu_info()
        vmem = int(getattr(info, "vmem_capacity_bytes", 0) or 0)
        if vmem >= 100 * 1024 * 1024:    # v5e / v6e: 128 MiB VMEM, single TC
            block_bytes = 12 * 1024 * 1024
            vmem_limit = 64 * 1024 * 1024
            min_steps = 1
    except Exception:
        pass
    return block_bytes, vmem_limit, min_steps


# ----------------------------------------------------------------------------- kernels


def _flat_kernel(pos_ref, x_ref, o_ref, *, seq_len, h_shift, tl):
    # pos_ref: VMEM (TB, 2) int32 [start, end] rows.
    # x_ref / o_ref: VMEM (TB, TL) tiles of the flattened (B, S*H) activation.
    # H is a power of two here, so j = flat_index >> log2(H).
    li = pl.program_id(1)

    se = pos_ref[...]
    start = se[:, 0:1]                                        # (TB, 1) int32
    end = se[:, 1:2]                                          # (TB, 1) int32
    sent_len = jnp.maximum(seq_len - (end - start + 1), 1).astype(jnp.float32)
    inv = 1.0 / sent_len                                      # (TB, 1) f32

    idx = li * tl + lax.broadcasted_iota(jnp.int32, (1, tl), 1)
    j = idx >> h_shift                                        # sequence position, (1, TL)

    d = jnp.maximum(start - j, j - end)                       # > 0 strictly outside span
    w = jnp.where(d > 0, 1.0 - d.astype(jnp.float32) * inv, 0.0)
    o_ref[...] = w.astype(o_ref.dtype) * x_ref[...]


def _rows_kernel(pos_ref, x_ref, o_ref, *, seq_len, batch, tb, ts):
    # pos_ref: SMEM int32 (2*B,) flat [start0, end0, start1, end1, ...]
    # x_ref / o_ref: VMEM (TB, TS, H) tiles (H = full hidden dim, never padded).
    bi = pl.program_id(0)
    si = pl.program_id(1)
    j = si * ts + lax.broadcasted_iota(jnp.int32, (ts, 1), 0)        # (TS, 1)

    for r in range(tb):                     # static unroll over packed batch rows
        # Clamp so a ragged last batch block reads a valid SMEM entry; its output
        # rows are dropped by Pallas on writeback anyway.
        b = jnp.minimum(bi * tb + r, batch - 1)
        start = pos_ref[2 * b]
        end = pos_ref[2 * b + 1]
        sent_len = jnp.maximum(seq_len - (end - start + 1), 1).astype(jnp.float32)
        inv = 1.0 / sent_len
        d = jnp.maximum(start - j, j - end)                          # (TS, 1)
        w = jnp.where(d > 0, 1.0 - d.astype(jnp.float32) * inv, 0.0)
        o_ref[r] = w.astype(o_ref.dtype) * x_ref[r]                  # (TS,1)*(TS,H)


# ----------------------------------------------------------------------------- wrappers


def _location_encoding_flat(x, pos, block_bytes, vmem_limit_bytes, min_steps):
    """Power-of-two H: flattened (B, S*H) view, fully lane-dense tiles."""
    B, S, H = x.shape
    L = S * H
    itemsize = jnp.dtype(x.dtype).itemsize
    sub = _sublane(x.dtype)
    block_elems = max(block_bytes // itemsize, 128 * sub)

    # Batch tile: equal to B, or a multiple of the sublane packing (both legal).
    if L <= block_elems:
        rows_budget = max(1, block_elems // L)
        if B <= rows_budget:
            TB = B
        else:
            TB = min(B, max(sub, (rows_budget // sub) * sub))
    else:
        TB = B if B < sub else sub

    # Lane tile over the flattened axis: multiple of 128 (or the whole axis),
    # balanced so the ragged last block wastes less than one tile of slack.
    per_row = max(128, block_elems // TB)
    if L <= per_row:
        TL = L
    else:
        n_l = pl.cdiv(L, per_row)
        TL = min(_round_up(pl.cdiv(L, n_l), 128), max(128, (L // 128) * 128))

    # Ensure enough grid steps so both v7x TensorCores get work.
    for _ in range(8):
        if pl.cdiv(B, TB) * pl.cdiv(L, TL) >= min_steps:
            break
        if TL >= 256:
            TL = _round_up(TL // 2, 128)
        elif TB > sub:
            TB = max(sub, (TB // 2) // sub * sub)
        else:
            break

    grid = (pl.cdiv(B, TB), pl.cdiv(L, TL))
    kernel = functools.partial(_flat_kernel, seq_len=S,
                               h_shift=int(H).bit_length() - 1, tl=TL)
    out = pl.pallas_call(
        kernel,
        out_shape=jax.ShapeDtypeStruct((B, L), x.dtype),
        grid=grid,
        in_specs=[pl.BlockSpec((TB, 2), lambda i, j: (i, 0)),
                  pl.BlockSpec((TB, TL), lambda i, j: (i, j))],
        out_specs=pl.BlockSpec((TB, TL), lambda i, j: (i, j)),
        compiler_params=pltpu.CompilerParams(
            dimension_semantics=("parallel", "parallel"),
            vmem_limit_bytes=vmem_limit_bytes),
        cost_estimate=pl.CostEstimate(
            flops=B * L, transcendentals=0,
            bytes_accessed=2 * B * L * itemsize),
    )(pos, x.reshape(B, L))          # reshape of a contiguous array: no HBM copy
    return out.reshape(B, S, H)


def _location_encoding_rows(x, pos, block_bytes, vmem_limit_bytes, min_steps,
                            max_tb=16):
    """General H: (TB, TS, H) blocks with the full hidden dim as last block dim."""
    B, S, H = x.shape
    itemsize = jnp.dtype(x.dtype).itemsize
    sub = _sublane(x.dtype)
    row_bytes = H * itemsize                        # bytes per sequence position

    rows_budget = max(sub, block_bytes // row_bytes)
    if S <= rows_budget:
        TS = S
        TB = int(min(B, max_tb, max(1, block_bytes // max(1, S * row_bytes))))
    else:
        TB = 1
        n_s = pl.cdiv(S, rows_budget)               # balanced tile count
        TS = _round_up(pl.cdiv(S, n_s), sub)
        if TS >= S:
            TS = S

    for _ in range(8):
        if pl.cdiv(B, TB) * pl.cdiv(S, TS) >= min_steps:
            break
        if TB >= 2:
            TB = (TB + 1) // 2                      # leading block dim: any size legal
            continue
        cand = _round_up(pl.cdiv(TS, 2), sub)
        if cand < TS:
            TS = cand
        else:
            break

    grid = (pl.cdiv(B, TB), pl.cdiv(S, TS))
    kernel = functools.partial(_rows_kernel, seq_len=S, batch=B, tb=TB, ts=TS)
    return pl.pallas_call(
        kernel,
        out_shape=jax.ShapeDtypeStruct((B, S, H), x.dtype),
        grid_spec=pltpu.PrefetchScalarGridSpec(
            num_scalar_prefetch=1,
            grid=grid,
            in_specs=[pl.BlockSpec((TB, TS, H), lambda i, j, pos: (i, j, 0))],
            out_specs=pl.BlockSpec((TB, TS, H), lambda i, j, pos: (i, j, 0)),
        ),
        compiler_params=pltpu.CompilerParams(
            dimension_semantics=("parallel", "parallel"),
            vmem_limit_bytes=vmem_limit_bytes),
        cost_estimate=pl.CostEstimate(
            flops=B * S * H, transcendentals=0,
            bytes_accessed=2 * B * S * H * itemsize),
    )(pos.reshape(-1), x)


def location_encoding(x, pos_inx, *, block_bytes=None, vmem_limit_bytes=None):
    """x: (B, S, H) float; pos_inx: (B, 2) int (inclusive start/end) -> (B, S, H)."""
    B, S, H = x.shape
    cfg_block, cfg_vmem, min_steps = _tpu_config()
    block_bytes = cfg_block if block_bytes is None else block_bytes
    vmem_limit_bytes = cfg_vmem if vmem_limit_bytes is None else vmem_limit_bytes
    pos = pos_inx.astype(jnp.int32)
    if H > 0 and (H & (H - 1)) == 0:
        # Power-of-two hidden dim: flattened, fully lane-dense path.
        return _location_encoding_flat(x, pos, block_bytes, vmem_limit_bytes, min_steps)
    # General H: full-H last block dim (no padding traffic; masked tail stores only).
    return _location_encoding_rows(x, pos, block_bytes, vmem_limit_bytes, min_steps)


# ----------------------------------------------------------------------------- test


def _reference(x, pos_inx):
    # Pure-JAX reference mirroring the PyTorch weight_matrix loops.
    B, S, H = x.shape
    j = jnp.arange(S)[None, :]                       # (1, S)
    start = pos_inx[:, 0:1].astype(jnp.int32)        # (B, 1)
    end = pos_inx[:, 1:2].astype(jnp.int32)          # (B, 1)
    aspect_len = end - start + 1
    sent_len = (S - aspect_len).astype(jnp.float32)
    w_left = 1.0 - (start - j).astype(jnp.float32) / sent_len
    w_right = 1.0 - (j - end).astype(jnp.float32) / sent_len
    w = jnp.where(j < start, w_left, jnp.where(j <= end, 0.0, w_right))
    return w[:, :, None] * x


if __name__ == "__main__":
    key = jax.random.PRNGKey(0)
    k1, k2 = jax.random.split(key)

    # Case 1: power-of-two hidden dim -> flattened lane-dense path (ragged lane tiles).
    B1, S1, H1 = 2, 9, 32
    x1 = jax.random.normal(k1, (B1, S1, H1), dtype=jnp.float32)
    pos1 = jnp.array([[2, 4], [3, 5]], dtype=jnp.int32)
    out1 = jax.block_until_ready(location_encoding(x1, pos1))
    ref1 = _reference(x1, pos1)
    assert out1.shape == (B1, S1, H1)
    assert jnp.allclose(out1, ref1, atol=1e-5, rtol=1e-5)

    # Case 2: non-power-of-two hidden dim -> full-H row path (ragged seq tiles).
    B2, S2, H2 = 3, 10, 48
    x2 = jax.random.normal(k2, (B2, S2, H2), dtype=jnp.float32)
    pos2 = jnp.array([[0, 2], [4, 9], [3, 3]], dtype=jnp.int32)
    out2 = jax.block_until_ready(location_encoding(x2, pos2))
    ref2 = _reference(x2, pos2)
    assert out2.shape == (B2, S2, H2)
    assert jnp.allclose(out2, ref2, atol=1e-5, rtol=1e-5)

    print("KERNEL_OK")
</pallas_src>

<mosaic_0001>
module attributes {stable_mosaic.version = 11 : i64} {
  func.func @_flat_kernel(%arg0: i32, %arg1: i32, %arg2: memref<2x2xi32, #tpu.memory_space<vmem>>, %arg3: memref<2x128xf32, #tpu.memory_space<vmem>>, %arg4: memref<2x128xf32, #tpu.memory_space<vmem>>) attributes {dimension_semantics = [#tpu.dimension_semantics<parallel>, #tpu.dimension_semantics<parallel>], iteration_bounds = array<i64: 1, 3>, scalar_prefetch = 0 : i64, scratch_operands = 0 : i64, tpu.core_type = #tpu.core_type<tc>, window_params = [{transform_indices = @transform_0, window_bounds = array<i64: 2, 2>}, {transform_indices = @transform_1, window_bounds = array<i64: 2, 128>}, {transform_indices = @transform_2, window_bounds = array<i64: 2, 128>}]} {
    %c0 = arith.constant 0 : index
    %c0_0 = arith.constant 0 : index
    %0 = vector.load %arg2[%c0, %c0_0] : memref<2x2xi32, #tpu.memory_space<vmem>>, vector<2x2xi32>
    %1 = vector.extract_strided_slice %0 {offsets = [0, 0], sizes = [2, 1], strides = [1, 1]} : vector<2x2xi32> to vector<2x1xi32>
    %2 = vector.extract_strided_slice %0 {offsets = [0, 1], sizes = [2, 1], strides = [1, 1]} : vector<2x2xi32> to vector<2x1xi32>
    %3 = arith.subi %2, %1 : vector<2x1xi32>
    %c1_i32 = arith.constant 1 : i32
    %4 = vector.broadcast %c1_i32 : i32 to vector<2x1xi32>
    %5 = arith.addi %3, %4 : vector<2x1xi32>
    %c9_i32 = arith.constant 9 : i32
    %6 = vector.broadcast %c9_i32 : i32 to vector<2x1xi32>
    %7 = arith.subi %6, %5 : vector<2x1xi32>
    %c1_i32_1 = arith.constant 1 : i32
    %8 = vector.broadcast %c1_i32_1 : i32 to vector<2x1xi32>
    %9 = arith.maxsi %7, %8 : vector<2x1xi32>
    %10 = arith.sitofp %9 : vector<2x1xi32> to vector<2x1xf32>
    %cst = arith.constant 1.000000e+00 : f32
    %11 = vector.broadcast %cst : f32 to vector<2x1xf32>
    %12 = arith.divf %11, %10 : vector<2x1xf32>
    %c128_i32 = arith.constant 128 : i32
    %13 = arith.muli %arg1, %c128_i32 : i32
    %14 = tpu.iota {dimensions = array<i32: 1>} : vector<1x128xi32>
    %15 = vector.broadcast %13 : i32 to vector<1x128xi32>
    %16 = arith.addi %15, %14 : vector<1x128xi32>
    %c5_i32 = arith.constant 5 : i32
    %17 = vector.broadcast %c5_i32 : i32 to vector<1x128xi32>
    %18 = arith.shrsi %16, %17 : vector<1x128xi32>
    %19 = vector.broadcast %1 : vector<2x1xi32> to vector<2x128xi32>
    %20 = vector.broadcast %18 : vector<1x128xi32> to vector<2x128xi32>
    %21 = arith.subi %19, %20 : vector<2x128xi32>
    %22 = vector.broadcast %18 : vector<1x128xi32> to vector<2x128xi32>
    %23 = vector.broadcast %2 : vector<2x1xi32> to vector<2x128xi32>
    %24 = arith.subi %22, %23 : vector<2x128xi32>
    %25 = arith.maxsi %21, %24 : vector<2x128xi32>
    %c0_i32 = arith.constant 0 : i32
    %26 = vector.broadcast %c0_i32 : i32 to vector<2x128xi32>
    %27 = arith.cmpi sgt, %25, %26 : vector<2x128xi32>
    %28 = arith.sitofp %25 : vector<2x128xi32> to vector<2x128xf32>
    %29 = vector.broadcast %12 : vector<2x1xf32> to vector<2x128xf32>
    %30 = arith.mulf %28, %29 : vector<2x128xf32>
    %cst_2 = arith.constant 1.000000e+00 : f32
    %31 = vector.broadcast %cst_2 : f32 to vector<2x128xf32>
    %32 = arith.subf %31, %30 : vector<2x128xf32>
    %cst_3 = arith.constant 0.000000e+00 : f32
    %33 = vector.broadcast %cst_3 : f32 to vector<2x128xf32>
    %34 = arith.select %27, %32, %33 : vector<2x128xi1>, vector<2x128xf32>
    %c0_4 = arith.constant 0 : index
    %c0_5 = arith.constant 0 : index
    %35 = vector.load %arg3[%c0_4, %c0_5] : memref<2x128xf32, #tpu.memory_space<vmem>>, vector<2x128xf32>
    %36 = arith.mulf %34, %35 : vector<2x128xf32>
    %c0_6 = arith.constant 0 : index
    %c0_7 = arith.constant 0 : index
    %37 = vector.load %arg4[%c0_6, %c0_7] : memref<2x128xf32, #tpu.memory_space<vmem>>, vector<2x128xf32>
    tpu.vector_store %arg4[%c0_6, %c0_7], %36 {strides = array<i32>} : memref<2x128xf32, #tpu.memory_space<vmem>>, vector<2x128xf32>,
    return
  }
  func.func @transform_0(%arg0: i32, %arg1: i32) -> (i32, i32) {
    %c0_i32 = arith.constant 0 : i32
    %c0_i32_0 = arith.constant 0 : i32
    return %arg0, %c0_i32 : i32, i32
  }
  func.func @transform_1(%arg0: i32, %arg1: i32) -> (i32, i32) {
    %c0_i32 = arith.constant 0 : i32
    return %arg0, %arg1 : i32, i32
  }
  func.func @transform_2(%arg0: i32, %arg1: i32) -> (i32, i32) {
    %c0_i32 = arith.constant 0 : i32
    return %arg0, %arg1 : i32, i32
  }
}

</mosaic_0001>

<bundles_post_ra>
// kernel: tpu_custom_call.1
= control target key start
LH: loop header
LB: loop body
LE: loop exit
PB: predicated region body
PF: predicated region fallthrough
CT: control target
= control target key end

     0   :  { %7 = vsyncpa [#allocation3], 0  ;;  %s774_s0 = inlined_call_operand.hbm [shape: s32[2,2], index: 0, kind: input, shape index: {}]   ;;  %s775_s1 = inlined_call_operand.hbm [shape: f32[2,288], index: 1, kind: input, shape index: {}]   ;;  %s776_s2 = inlined_call_operand.hbm [shape: f32[2,288], index: 2, kind: output, shape index: {}]  }
   0x1   :  { %8 = vsyncpa [#allocation6], 0 }
   0x2   :  { %10 = vsyncpa [#allocation6 + $0x1], 0 }
   0x3   :  { %11 = vsyncpa [#allocation4], 0 }
   0x4   :  { %13 = vsyncpa [#allocation4 + $0x1], 0  ;;  %s607_s9 = smov 0   ;;  %s609_s10 = smov 0  }
   0x5   :  { %s611_s11 = smov 0   ;;  %s613_s12 = smov 0  }
   0x6   :  { %s615_s13 = smov 0   ;;  %s617_s14 = smov 0  }
   0x7 LB: > { %s349_s15 = sadd.s32 4294967295, %s584_s14   ;;  %s350_s16 = sadd.s32 4294967294, %s584_s14   ;;  %s584_s14 = sphi %s617_s14, %s19_s14   ;;  %s580_s13 = sphi %s615_s13, %s792_s13   ;;  %s576_s12 = sphi %s613_s12, %s791_s12   ;;  %s572_s11 = sphi %s611_s11, %s790_s11   ;;  %s568_s10 = sphi %s609_s10, %s789_s10   ;;  %s564_s9 = sphi %s607_s9, %s788_s9  }
   0x8   : > { %p79_p0 = scmp.ne.s32.totalorder %s568_s10, %s564_s9  ;;  %p641_p1 = scmp.eq.s32.totalorder %s349_s15, 0 }
   0x9   : > { %p645_p2 = scmp.eq.s32.totalorder %s349_s15, 2  ;;  %p111_p3 = scmp.eq.s32.totalorder %s350_s16, 2 }
   0xa   : > { %p651_p4 = por %p641_p1, %p79_p0  ;;  %p351_p5 = scmp.ge.s32.totalorder %s584_s14, 1 }
   0xb   : > { %p656_p6 = por %p111_p3, %p79_p0  ;;  %p118_p7 = scmp.lt.s32.totalorder %s584_s14, 4 }
   0xc   : > { %s780_s19 = scalar_select %p651_p4, 1, 0 }
   0xd   : > { %s781_s20 = scalar_select %p656_p6, 1, 0 }
   0xe   : > { %p661_p8 = pnand %p351_p5, %p118_p7  ;;  %s586_s22 = smov [#allocation2]  }
   0xf   : > { %s133_s23 = sshll.u32 %s586_s22, 4  ;;  %s28_s25 = sadd.s32 1, %s580_s13  ;;  %s134_s23 = int_to_ptr.vmem [resolvable:$true] %s133_s23 }
  0x10   : > { %p373_p9 = pneg %p661_p8  ;;  %s66_s26 = sadd.s32 1, %s572_s11 }
  0x11   : > { %p29_p11 = scmp.ge.s32.totalorder %s28_s25, 3  ;;  %s457_s27 = scalar_lea.vmem %s134_s23, 32 }
  0x12   : > { %p669_p10 = pnand %p373_p9, %p641_p1  ;;  %p458_p13 = scmp.ne.s32.totalorder %s134_s23, %s457_s27 }
  0x13   : > { %p465_p5 = scmp.lt.s32.totalorder %s134_s23, %s134_s23  ;;  %p466_p7 = scmp.lt.s32.totalorder %s457_s27, %s457_s27 }
  0x14   : > { %p448_p12 = pneg %p669_p10 }
  0x15   : > { %p467_p6 = por %p466_p7, %p465_p5 }
  0x16   : > { %p460_p0 = pnand %p458_p13, %p448_p12 }
  0x18   : > { %p461_p3 = pneg %p460_p0 }
  0x1a   : > { %p468_p4 = pnand %p467_p6, %p461_p3 }
  0x1c   : > { %471 = shalt.err (!%p468_p4)
}
  0x1d   : > { %376 = dma.hbm_to_vmem [thread:$0]  (!%p669_p10), %s774_s0, 32, %s134_s23, [#allocation3]  }
  0x1e   : > { %s794_s25 = smov (%p29_p11, %s28_s25), 0  ;;  %p73_p6 = scmp.ne.s32.totalorder %s572_s11, %s568_s10 }
  0x1f   : > { %p74_p4 = scmp.eq.s32.totalorder %s584_s14, 0  ;;  %s62_s30 = ssub.s32 %s580_s13, %s794_s25 }
  0x20   : > { %p386_p9 = scmp.lt.s32.totalorder %s584_s14, 3  ;;  %p64_p12 = scmp.eq.s32.totalorder %s62_s30, 0 }
  0x21   : > { %p75_p13 = por %p74_p4, %p73_p6  ;;  %p692_p0 = por %p645_p2, %p73_p6 }
  0x22   : > { %s144_s4 = sand.u32 1, %s572_s11   ;;  %s355_s7 = sshll.u32 %s580_s13, 5 }
  0x23   : > { %s698_s5 = scalar_select %p64_p12, %s572_s11, %s66_s26  }
  0x24   : > { %s354_s6 = sshll.u32 %s144_s4, 1  ;;  %s155_s16 = scalar_lea.hbm %s775_s1, %s355_s7 }
  0x25   : > { %s148_s22 = scalar_lea.vmem [#allocation5], %s354_s6  ;;  %p704_p10 = pnand %p386_p9, %p75_p13 }
  0x26   : > { %s157_s23 = sshll.u32 %s148_s22, 4  ;;  %s145_s18 = scalar_lea.sflag [#allocation6], %s144_s4  ;;  %s158_s23 = int_to_ptr.vmem [resolvable:$true] %s157_s23 }
  0x27   : > { %p474_p2 = pneg %p704_p10  ;;  %s485_s27 = scalar_lea.vmem %s158_s23, 32 }
  0x28   : > { %p486_p11 = scmp.ne.s32.totalorder %s158_s23, %s485_s27  ;;  %s587_s26 = smov [#allocation5]  }
  0x29   : > { %s490_s28 = sshll.u32 %s587_s26, 4  ;;  %s491_s28 = int_to_ptr.vmem [resolvable:$false] %s490_s28 }
  0x2a   : > { %p488_p3 = pnand %p486_p11, %p474_p2  ;;  %s492_s29 = scalar_lea.vmem %s491_s28, 64 }
  0x2b   : > { %p493_p7 = scmp.lt.s32.totalorder %s158_s23, %s491_s28  ;;  %p494_p6 = scmp.lt.s32.totalorder %s492_s29, %s485_s27 }
  0x2c   : > { %p489_p5 = pneg %p488_p3 }
  0x2d   : > { %p495_p4 = por %p494_p6, %p493_p7 }
  0x2f   : > { %p496_p12 = pnand %p495_p4, %p489_p5 }
  0x31   : > { %499 = shalt.err (!%p496_p12)
}
  0x32   : > { %380 = dma.hbm_to_vmem [thread:$0]  (!%p704_p10), %s155_s16, 32, %s158_s23, %s145_s18  }
  0x33   : > { %166 = sbr.rel (%p661_p8) target bundleno = 346 (0x15a), region = 28 }
  0x38   : > { %551 = dma.done.wait (%p641_p1), [#allocation3], 32  }
  0x39   : > { %553 = vsyncadd (%p641_p1), [#allocation3], 4294967264  ;;  %s719_s30 = sand.u32 1, %s568_s10   ;;  %p786_p9 = scmp.ne.s32.totalorder %s780_s19, 0 }
  0x3a   : > { %s358_s4 = sshll.u32 %s719_s30, 1  ;;  %s173_s6 = scalar_lea.sflag [#allocation6], %s719_s30 }
  0x3b   : > { %s725_s7 = scalar_lea.vmem [#allocation5], %s358_s4 }
  0x3c   : > { %555 = dma.done.wait (%p786_p9), %s173_s6, 32  }
  0x3d   : > { %557 = vsyncadd (%p786_p9), %s173_s6, 4294967264  ;;  %v588_v0 = vmov 1   ;;  %v589_v1 = vmov 0   ;;  %v197_v2 = vld [vmem:[#allocation2] sm:$0x3]  ;;  %s590_s17 = smov 1   ;;  %v209_v10 = vlaneseq }
  0x3e   : > { %442 = vset.pattern.permute.xlu1 %v588_v0  ;;  %441 = vset.pattern.permute.xlu0 %v589_v1  ;;  %s360_s19 = sshll.u32 %s576_s12, 7  ;;  %v234_v23 = vld [vmem:[%s725_s7] sm:$0x3]  ;;  %s362_s21 = sshll.u32 %s576_s12, 5 }
  0x3f   : > { %198 = vrot.lane.b32.xlu0 %v197_v2, %s590_s17  ;;  %219 = vperm.xlu1 %442, %v197_v2   ;;  %v210_v11 = vand.u32 127, %v209_v10  ;;  %v211_v12 = vstv %s360_s19  ;;  %s196_s8 = scalar_lea.vmem [#allocation7], %s358_s4  ;;  %s251_s23 = scalar_lea.hbm %s776_s2, %s362_s21 }
  0x40   : > { %s253_s15 = sshll.u32 %s196_s8, 4  ;;  %s238_s24 = scalar_lea.sflag [#allocation4], %s719_s30  ;;  %s254_s15 = int_to_ptr.vmem [resolvable:$true] %s253_s15 }
  0x41   : > { %v212_v13 = vadd.s32 %v211_v12, %v210_v11  ;;  %s500_s18 = scalar_lea.vmem %s254_s15, 32  ;;  %s591_s27 = smov [#allocation7]  }
  0x42   : > { %p501_p1 = scmp.ne.s32.totalorder %s254_s15, %s500_s18  ;;  %s504_s12 = sshll.u32 %s591_s27, 4  ;;  %s505_s12 = int_to_ptr.vmem [resolvable:$false] %s504_s12 }
  0x43   : > { %215 = vperm.xlu0 %441, %v197_v2   ;;  %v213_v14 = vshra.s32 %v212_v13, 5  ;;  %s506_s26 = scalar_lea.vmem %s505_s12, 64  ;;  %p507_p10 = scmp.lt.s32.totalorder %s254_s15, %s505_s12 }
  0x44   : > { %p502_p8 = pnand %p501_p1, %p692_p0  ;;  %p508_p2 = scmp.lt.s32.totalorder %s506_s26, %s500_s18 }
  0x46   : > { %p503_p13 = pneg %p502_p8  ;;  %p509_p11 = por %p508_p2, %p507_p10 }
  0x47   : > { %443 = vset.pattern.permute.xlu0 %v588_v0 }
  0x48   : > { %p510_p3 = pnand %p509_p11, %p503_p13 }
  0xb1   : > { %v199_v3 = vpop.permute.xlu0 %198 }
  0xb2   : > { %v200_v4 = vsub.s32 %v197_v2, %v199_v3 }
  0xb4   : > { %v201_v5 = vadd.s32 1, %v200_v4 }
  0xb6   : > { %v202_v6 = vsub.s32 9, %v201_v5 }
  0xb8   : > { %vm203_vm0 = vcmp.gt.s32.totalorder %v202_v6, 1 }
  0xb9   : > { %v204_v7 = vsel %vm203_vm0, %v202_v6, 1 }
  0xba   : > { %v205_v8 = vcvt.s32.f32 %v204_v7  ;;  %v220_v15 = vpop.permute.xlu1 %219 }
  0xbb   : > { %v221_v17 = vsub.s32 %v213_v14, %v220_v15 }
  0xbc   : > { %444 = vrcp.f32 %v205_v8 }
  0xbe   : > { %v216_v16 = vpop.permute.xlu0 %215 }
  0xbf   : > { %v217_v18 = vsub.s32 %v216_v16, %v213_v14 }
  0xc1   : > { %vm222_vm1 = vcmp.gt.s32.totalorder %v217_v18, %v221_v17 }
  0xc2   : > { %v223_v19 = vsel %vm222_vm1, %v217_v18, %v221_v17 }
  0xc3   : > { %v225_v20 = vcvt.s32.f32 %v223_v19  ;;  %vm224_vm2 = vcmp.gt.s32.totalorder %v223_v19, 0 }
  0xc9   : > { %v445_v9 = vpop.eup %444 }
  0xca   : > { %228 = vperm.xlu1 %442, %v445_v9  }
 0x145   : > { %v229_v21 = vpop.permute.xlu1 %228 }
 0x146   : > { %v231_v22 = vmul.f32 %v229_v21, %v225_v20 }
 0x148   : > { %v232_v24 = vsub.f32 1.0, %v231_v22 }
 0x14a   : > { %v233_v25 = vsel %vm224_vm2, %v232_v24, 0.0 }
 0x14b   : > { %v235_v26 = vmul.f32 %v234_v23, %v233_v25 }
 0x14d   : > { %236 = vst [vmem:[%s196_s8] sm:$0x3] %v235_v26 }
 0x14e   : > { %513 = shalt.err (!%p510_p3)
}
 0x14f   : > { %s514_s28 = scalar_lea.hbm %s251_s23, 32  ;;  %s518_s4 = scalar_lea.hbm %s776_s2, 96 }
 0x150   : > { %p515_p5 = scmp.ne.s32.totalorder %s251_s23, %s514_s28  ;;  %p519_p4 = scmp.lt.s32.totalorder %s251_s23, %s776_s2 }
 0x151   : > { %p520_p12 = scmp.lt.s32.totalorder %s518_s4, %s514_s28 }
 0x152   : > { %p516_p7 = pnand %p515_p5, %p692_p0 }
 0x153   : > { %p521_p9 = por %p520_p12, %p519_p4 }
 0x154   : > { %p517_p6 = pneg %p516_p7 }
 0x156   : > { %p522_p1 = pnand %p521_p9, %p517_p6 }
 0x158   : > { %525 = shalt.err (!%p522_p1)
}
 0x159   : > { %371 = dma.vmem_to_hbm [thread:$0]  (%p692_p0), %s254_s15, 32, %s251_s23, %s238_s24  }
 0x15a PF: > { %p388_p8 = scmp.ge.s32.totalorder %s584_s14, 2  ;;  %s265_s17 = sand.u32 1, %s564_s9  }
 0x15b   : > { %p787_p13 = scmp.ne.s32.totalorder %s781_s20, 0  ;;  %s266_s19 = scalar_lea.sflag [#allocation4], %s265_s17 }
 0x15d   : > { %p382_p10 = pnand %p388_p8, %p787_p13 }
 0x15f   : > { %p383_p2 = pneg %p382_p10 }
 0x161   : > { %559 = dma.done.wait (%p383_p2), %s266_s19, 32  }
 0x162   : > { %561 = vsyncadd (%p383_p2), %s266_s19, 4294967264  ;;  %s19_s14 = sadd.s32 1, %s584_s14   ;;  %s788_s9 = smov %s568_s10 }
 0x163   : > { %p16_p11 = scmp.ge.s32.totalorder %s19_s14, 5   ;;  %s789_s10 = smov %s572_s11 }
 0x164   : > { %s790_s11 = smov %s698_s5  ;;  %s791_s12 = smov %s580_s13 }
 0x165   : > { %s792_s13 = smov %s794_s25  ;;  %18 = sbr.rel (!%p16_p11) target bundleno = 7 (0x7), region = 79 }
 0x16a   :  { %271 = vsyncpa [#allocation3], 1 }
 0x16b   :  { %273 = vsyncpa [#allocation3 + $0x1], 1 }
 0x16c   :  { %274 = vsyncpa [#allocation6], 1 }
 0x16d   :  { %276 = vsyncpa [#allocation6 + $0x1], 1 }
 0x16e   :  { %277 = vsyncpa [#allocation4], 1 }
 0x16f   :  { %279 = vsyncpa [#allocation4 + $0x1], 1 }

</bundles_post_ra>
